<compile_context>
chip_gen: v6e
topology: v6e:2x2x1
jax: 0.10.0
libtpu: 0.0.40
codegen_flags: <defaults>
</compile_context>

<pallas_src>
import functools

import jax
import jax.numpy as jnp
import numpy as np
from jax.experimental import pallas as pl
from jax.experimental.pallas import tpu as pltpu


# ----------------------------------------------------------------------------
# Kernel body: one banded-matrix MXU matmul per batch row in the block.
# ----------------------------------------------------------------------------
def _moving_avg_kernel(a_ref, x_ref, o_ref, *, bt, inv_k):
    """out[b] = (A @ x[b]) * (1/k) for each batch row of the block.

    a_ref : (Lout, L)      f32 banded tap-count matrix (edge replication and
                           stride folded in); VMEM-resident across the grid.
    x_ref : (Bt, L, TC)    input block.
    o_ref : (Bt, Lout, TC) output block.
    """
    a = a_ref[...]
    for b in range(bt):                      # static unroll, bt <= 8
        xb = x_ref[b].astype(jnp.float32)
        acc = jnp.dot(a, xb, preferred_element_type=jnp.float32)   # MXU
        o_ref[b] = (acc * inv_k).astype(o_ref.dtype)               # VPU scale


# ----------------------------------------------------------------------------
# Banded pooling matrix (host-side, cached per (L, k, stride))
# ----------------------------------------------------------------------------
@functools.lru_cache(maxsize=None)
def _count_matrix(L, kernel_size, stride):
    """(Lout, L) f32 matrix of window-tap counts.

    Row o counts, for every input timestep l, how many taps of output window o
    land on l after edge replication (front = k-1-(k-1)//2, end = (k-1)//2
    copies of the boundary rows) and stride subsampling.  Entries are small
    integers, so the matrix is exact in bf16 as well as f32 (independent of
    which MXU pass mode is used); the 1/k scale is applied in the kernel.
    """
    k = kernel_size
    front_n = k - 1 - (k - 1) // 2
    Lout = (L - 1) // stride + 1
    A = np.zeros((Lout, L), np.float32)
    for o in range(Lout):
        for j in range(k):
            l = min(max(o * stride + j - front_n, 0), L - 1)
            A[o, l] += 1.0
    return jnp.asarray(A)


# ----------------------------------------------------------------------------
# Tile-size selection (generation-aware VMEM budgeting)
# ----------------------------------------------------------------------------
def _vmem_estimate(Bt, L, Lout, TC, esize):
    f32 = 4
    b = 2 * Lout * L * f32                    # resident pooling matrix (2 slots)
    b += 2 * Bt * L * TC * esize              # double-buffered input blocks
    b += 2 * Bt * Lout * TC * esize           # double-buffered output blocks
    b += 2 * (L + Lout) * TC * f32            # live f32 cast + matmul accumulator
    return b


def _largest_divisor_leq(n, cap):
    for d in range(max(min(cap, n), 1), 0, -1):
        if n % d == 0:
            return d
    return 1


# ----------------------------------------------------------------------------
# pallas_call builder + public wrapper
# ----------------------------------------------------------------------------
@functools.lru_cache(maxsize=None)
def _build_call(B, L, C, kernel_size, stride, dtype_name):
    dtype = jnp.dtype(dtype_name)
    esize = dtype.itemsize
    Lout = (L - 1) // stride + 1

    # ---- generation-aware budgets (v5e/v6e: 128 MiB VMEM, v7x: 64 MiB/TC) ---
    try:
        cap = int(getattr(pltpu.get_tpu_info(), "vmem_capacity_bytes", 64 << 20))
    except Exception:
        cap = 64 << 20                                   # conservative default
    budget = max(8 << 20, min(cap // 4, 32 << 20))       # per-grid-step budget

    # ---- channel tile: lane-dense (multiple of 128) whenever possible -------
    if C % 128 == 0:
        cands = sorted((d for d in range(128, C + 1, 128) if C % d == 0),
                       reverse=True)
        TC = next((d for d in cands
                   if _vmem_estimate(1, L, Lout, d, esize) <= budget), 128)
    else:
        # Full channel extent (block_shape may equal the full array dim).  For
        # C < 128 this gives masked partial-lane stores; such problems are
        # tiny / overhead-bound.
        # TODO(synk): for small C with large B, fold batch into the lane axis
        # (wrapper-side layout plumbing) to get lane-dense stores.
        TC = C

    # ---- batch tile: pack rows per step to amortize per-step overhead -------
    Bt = 1
    for cand in range(2, min(B, 8) + 1):                 # cap in-kernel unroll
        if B % cand == 0 and _vmem_estimate(cand, L, Lout, TC, esize) <= budget:
            Bt = cand

    # ---- v7x megacore: guarantee >= 2 grid steps along a parallel axis ------
    # (negligible cost on 1-TC chips, 2x on v7x when the grid would be (1,1))
    if (B // Bt) * (C // TC) < 2:
        if B >= 2:
            Bt = _largest_divisor_leq(B, B // 2)
        elif C % 128 == 0 and C // 128 >= 2:
            TC = max((d for d in range(128, C // 2 + 1, 128) if C % d == 0),
                     default=TC)

    grid = (B // Bt, C // TC)
    est = _vmem_estimate(Bt, L, Lout, TC, esize)
    vmem_limit = max(min(cap * 3 // 4, max(48 << 20, 2 * est)), est + (4 << 20))
    vmem_limit = int(min(vmem_limit, cap))

    kernel = functools.partial(_moving_avg_kernel, bt=Bt, inv_k=1.0 / kernel_size)

    return pl.pallas_call(
        kernel,
        out_shape=jax.ShapeDtypeStruct((B, Lout, C), dtype),
        grid_spec=pltpu.PrefetchScalarGridSpec(
            num_scalar_prefetch=0,
            grid=grid,
            in_specs=[
                pl.BlockSpec((Lout, L), lambda b, c: (0, 0)),      # resident A
                pl.BlockSpec((Bt, L, TC), lambda b, c: (b, 0, c)),
            ],
            out_specs=pl.BlockSpec((Bt, Lout, TC), lambda b, c: (b, 0, c)),
        ),
        compiler_params=pltpu.CompilerParams(
            dimension_semantics=("parallel", "parallel"),
            vmem_limit_bytes=vmem_limit,
        ),
    )


def moving_avg(x, kernel_size, stride):
    """Pallas forward pass of the PyTorch `moving_avg` module.

    x: [B, L, C].  Returns [B, Lout, C] with Lout = (L - 1) // stride + 1
    (edge replication of front = k-1-(k-1)//2 rows and end = (k-1)//2 rows,
    exactly as in the reference module, then AvgPool1d(k, stride)).
    """
    assert x.ndim == 3, "expected [batch, seq_len, channels]"
    assert kernel_size >= 1 and stride >= 1
    B, L, C = x.shape
    call = _build_call(B, L, C, int(kernel_size), int(stride),
                       jnp.dtype(x.dtype).name)
    A = _count_matrix(L, int(kernel_size), int(stride))
    return call(A, x)


# ----------------------------------------------------------------------------
# Pure-JAX reference (mirrors the PyTorch forward exactly)
# ----------------------------------------------------------------------------
def moving_avg_reference(x, kernel_size, stride):
    front_n = kernel_size - 1 - (kernel_size - 1) // 2
    end_n = (kernel_size - 1) // 2
    pieces = []
    if front_n:
        pieces.append(jnp.repeat(x[:, 0:1, :], front_n, axis=1))
    pieces.append(x)
    if end_n:
        pieces.append(jnp.repeat(x[:, -1:, :], end_n, axis=1))
    xp = jnp.concatenate(pieces, axis=1)
    Lp = xp.shape[1]
    Lout = (Lp - kernel_size) // stride + 1
    outs = [jnp.mean(xp[:, t * stride:t * stride + kernel_size, :], axis=1)
            for t in range(Lout)]
    return jnp.stack(outs, axis=1)


# ----------------------------------------------------------------------------
# Self-test
# ----------------------------------------------------------------------------
if __name__ == "__main__":
    key = jax.random.PRNGKey(0)
    k1, k2, k3 = jax.random.split(key, 3)

    def _bf16_snapped_normal(k, shape):
        # Snap test data to bf16-representable values: combined with the
        # integer-valued tap-count matrix, every MXU product is exact no
        # matter which f32 matmul pass mode is selected, so the comparison
        # below can use tight tolerances.
        x = jax.random.normal(k, shape, dtype=jnp.float32)
        return x.astype(jnp.bfloat16).astype(jnp.float32)

    # Config 1: Autoformer default decomposition (odd k=25, stride=1), small C
    # (C < 128 -> single full-channel block, batch split across grid steps).
    x1 = _bf16_snapped_normal(k1, (2, 32, 8))
    out1 = jax.block_until_ready(moving_avg(x1, kernel_size=25, stride=1))
    ref1 = moving_avg_reference(x1, 25, 1)
    np.testing.assert_allclose(np.asarray(out1), np.asarray(ref1),
                               rtol=1e-5, atol=1e-5)

    # Config 2: lane-dense channels (C=128), even kernel_size, stride > 1
    # (the stride is folded into the pooling matrix; no strided memory access).
    x2 = _bf16_snapped_normal(k2, (2, 16, 128))
    out2 = jax.block_until_ready(moving_avg(x2, kernel_size=4, stride=2))
    ref2 = moving_avg_reference(x2, 4, 2)
    np.testing.assert_allclose(np.asarray(out2), np.asarray(ref2),
                               rtol=1e-5, atol=1e-5)

    # Config 3: multi-step grid (B=4, C=256) at a more Autoformer-like length.
    x3 = _bf16_snapped_normal(k3, (4, 96, 256))
    out3 = jax.block_until_ready(moving_avg(x3, kernel_size=25, stride=1))
    ref3 = moving_avg_reference(x3, 25, 1)
    np.testing.assert_allclose(np.asarray(out3), np.asarray(ref3),
                               rtol=1e-5, atol=1e-5)

    print("KERNEL_OK")
</pallas_src>

<mosaic_0001>
module attributes {stable_mosaic.version = 11 : i64} {
  func.func @_moving_avg_kernel(%arg0: i32, %arg1: i32, %arg2: memref<32x32xf32, #tpu.memory_space<vmem>>, %arg3: memref<1x32x8xf32, #tpu.memory_space<vmem>>, %arg4: memref<1x32x8xf32, #tpu.memory_space<vmem>>) attributes {dimension_semantics = [#tpu.dimension_semantics<parallel>, #tpu.dimension_semantics<parallel>], iteration_bounds = array<i64: 2, 1>, scalar_prefetch = 0 : i64, scratch_operands = 0 : i64, tpu.core_type = #tpu.core_type<tc>, window_params = [{pipeline_mode = #tpu.pipeline_mode<synchronous>, transform_indices = @transform_0, window_bounds = array<i64: 32, 32>}, {transform_indices = @transform_1, window_bounds = array<i64: 1, 32, 8>}, {transform_indices = @transform_2, window_bounds = array<i64: 1, 32, 8>}]} {
    %c0 = arith.constant 0 : index
    %c0_0 = arith.constant 0 : index
    %0 = vector.load %arg2[%c0, %c0_0] : memref<32x32xf32, #tpu.memory_space<vmem>>, vector<32x32xf32>
    %c0_1 = arith.constant 0 : index
    %c0_2 = arith.constant 0 : index
    %c0_3 = arith.constant 0 : index
    %1 = vector.load %arg3[%c0_1, %c0_2, %c0_3] : memref<1x32x8xf32, #tpu.memory_space<vmem>>, vector<1x32x8xf32>
    %2 = vector.shape_cast %1 : vector<1x32x8xf32> to vector<32x8xf32>
    %cst = arith.constant dense<0.000000e+00> : vector<32x8xf32>
    %3 = tpu.matmul %0, %2, %cst {dimension_numbers = #tpu.dot_dimension_numbers<[1], [0], [0], [1], [0, 0, 1, 1], [], []>} : vector<32x32xf32>, vector<32x8xf32>, vector<32x8xf32> -> vector<32x8xf32>
    %cst_4 = arith.constant 4.000000e-02 : f32
    %4 = vector.broadcast %cst_4 : f32 to vector<32x8xf32>
    %5 = arith.mulf %3, %4 : vector<32x8xf32>
    %c0_5 = arith.constant 0 : index
    %c0_6 = arith.constant 0 : index
    %c0_7 = arith.constant 0 : index
    %6 = vector.load %arg4[%c0_5, %c0_6, %c0_7] : memref<1x32x8xf32, #tpu.memory_space<vmem>>, vector<1x32x8xf32>
    %7 = vector.shape_cast %6 : vector<1x32x8xf32> to vector<32x8xf32>
    %8 = vector.shape_cast %5 : vector<32x8xf32> to vector<1x32x8xf32>
    tpu.vector_store %arg4[%c0_5, %c0_6, %c0_7], %8 {strides = array<i32>} : memref<1x32x8xf32, #tpu.memory_space<vmem>>, vector<1x32x8xf32>,
    return
  }
  func.func @transform_0(%arg0: i32, %arg1: i32) -> (i32, i32) {
    %c0_i32 = arith.constant 0 : i32
    %c0_i32_0 = arith.constant 0 : i32
    %c0_i32_1 = arith.constant 0 : i32
    return %c0_i32, %c0_i32_0 : i32, i32
  }
  func.func @transform_1(%arg0: i32, %arg1: i32) -> (i32, i32, i32) {
    %c0_i32 = arith.constant 0 : i32
    %c0_i32_0 = arith.constant 0 : i32
    return %arg0, %c0_i32, %arg1 : i32, i32, i32
  }
  func.func @transform_2(%arg0: i32, %arg1: i32) -> (i32, i32, i32) {
    %c0_i32 = arith.constant 0 : i32
    %c0_i32_0 = arith.constant 0 : i32
    return %arg0, %c0_i32, %arg1 : i32, i32, i32
  }
}

</mosaic_0001>

<bundles_post_ra>
// kernel: tpu_custom_call.1
= control target key start
LH: loop header
LB: loop body
LE: loop exit
PB: predicated region body
PF: predicated region fallthrough
CT: control target
= control target key end

     0   :  { %s483_s9 = smov 0   ;;  %s485_s10 = smov 0   ;;  %s532_s0 = inlined_call_operand.vmem [shape: f32[32,32], index: 0, kind: input, shape index: {}]   ;;  %s533_s1 = inlined_call_operand.vmem [shape: f32[2,32,8], index: 1, kind: input, shape index: {}]   ;;  %s534_s2 = inlined_call_operand.vmem [shape: f32[2,32,8], index: 2, kind: output, shape index: {}]  }
   0x1   :  { %s487_s11 = smov 0  }
   0x2 LB: > { %s24_s12 = sadd.s32 1, %s462_s10  ;;  %p377_p0 = scmp.ge.s32.totalorder %s466_s11, 1  ;;  %s466_s11 = sphi %s487_s11, %s12_s11   ;;  %s462_s10 = sphi %s485_s10, %s536_s10   ;;  %s458_s9 = sphi %s483_s9, %s535_s9  }
   0x3   : > { %p26_p1 = scmp.ge.s32.totalorder %s24_s12, 2  ;;  %p131_p2 = scmp.lt.s32.totalorder %s466_s11, 3 }
   0x5   : > { %s538_s12 = smov (%p26_p1, %s24_s12), 0  ;;  %p132_p3 = pnand %p377_p0, %p131_p2 }
   0x6   : > { %p159_p4 = scmp.lt.s32.totalorder (!%p132_p3), %s458_s9, 1 }
   0x7   : > { %135 = sbr.rel (%p132_p3) target bundleno = 222 (0xde), region = 28 }
   0xc   : > { %v175_v0 = vld [vmem:[%s532_s0] sm:$0xff]  ;;  %vm183_vm0 = vcmask 261120   ;;  %v177_v1 = vld [vmem:[%s532_s0 + $0x10] sm:$0xff]  ;;  %s540_s9 = smov (!%p159_p4, %s458_s9), 1  ;;  %v176_v6 = vld [vmem:[%s532_s0 + $0x8] sm:$0xff]  ;;  %vm285_vm1 = vcmask 64512  }
   0xd   : > { %406 = vmatprep.mubr.msk.f32.mxu0 %vm183_vm0, %v175_v0  ;;  %409 = vmatprep.mubr.msk.f32.mxu1 %vm183_vm0, %v177_v1  ;;  %s388_s17 = sshll.u32 %s540_s9, 5  ;;  %v178_v7 = vld [vmem:[%s532_s0 + $0x18] sm:$0xff] }
   0xe   : > { %s166_s20 = scalar_lea.vmem %s533_s1, %s388_s17  ;;  %s174_s27 = scalar_lea.vmem %s534_s2, %s388_s17 }
   0xf   : > { %v182_v2 = vld [vmem:[%s166_s20 + $0x18] sm:$0xff]  ;;  %v181_v3 = vld [vmem:[%s166_s20 + $0x10] sm:$0xff]  ;;  %v180_v4 = vld [vmem:[%s166_s20 + $0x8] sm:$0xff] }
  0x10   : > { %398 = vmatprep.subr.mxu0 %v182_v2  ;;  %412 = vmatprep.subr.mxu1 %v182_v2  ;;  %v179_v5 = vld [vmem:[%s166_s20] sm:$0xff] }
  0x11   : > { %399 = vmatpush3.msra.mxu0 %v182_v2  ;;  %416 = vmatpush3.msra.mxu1 %v182_v2 }
  0x12   : > { %400 = vmatprep.subr.mxu0 %v181_v3  ;;  %413 = vmatprep.subr.mxu1 %v181_v3 }
  0x13   : > { %401 = vmatpush3.msra.mxu0 %v181_v3  ;;  %417 = vmatpush3.msra.mxu1 %v181_v3 }
  0x14   : > { %402 = vmatprep.subr.mxu0 %v180_v4  ;;  %414 = vmatprep.subr.mxu1 %v180_v4 }
  0x15   : > { %403 = vmatpush3.msra.mxu0 %v180_v4  ;;  %418 = vmatpush3.msra.mxu1 %v180_v4 }
  0x16   : > { %404 = vmatprep.subr.mxu0 %v179_v5  ;;  %415 = vmatprep.subr.mxu1 %v179_v5 }
  0x17   : > { %405 = vmatpush3.msra.mxu0 %v179_v5  ;;  %419 = vmatpush3.msra.mxu1 %v179_v5 }
  0x18   : > { %407 = vmatmul.mubr.msk.f32.vlgmr.msra.gmra.mxu0 %vm183_vm0, %v176_v6  ;;  %410 = vmatmul.mubr.msk.f32.vlgmr.msra.gmra.mxu1 %vm183_vm0, %v178_v7 }
  0xd8   : > { %v408_v8 = vpop.f32.mrf.mxu0  ;;  %v411_v9 = vpop.f32.mrf.mxu1 }
  0xd9   : > { %v282_v10 = vmul.f32 0.04, %v408_v8  ;;  %v284_v11 = vmul.f32 0.04, %v411_v9 }
  0xda   : > { %v262_v12 = vpop.f32.mrf.mxu0  ;;  %v272_v13 = vpop.f32.mrf.mxu1 }
  0xdb   : > { %287 = vst.msk [vmem:[%s174_s27 + $0x8] sm:$0xff] %vm285_vm1, %v282_v10  ;;  %289 = vst.msk [vmem:[%s174_s27 + $0x18] sm:$0xff] %vm285_vm1, %v284_v11  ;;  %v281_v14 = vmul.f32 0.04, %v262_v12  ;;  %v283_v15 = vmul.f32 0.04, %v272_v13 }
  0xdd   : > { %286 = vst.msk [vmem:[%s174_s27] sm:$0xff] %vm285_vm1, %v281_v14  ;;  %288 = vst.msk [vmem:[%s174_s27 + $0x10] sm:$0xff] %vm285_vm1, %v283_v15 }
  0xde PF: > { %s12_s11 = sadd.s32 1, %s466_s11   ;;  %s535_s9 = smov %s462_s10 }
  0xdf   : > { %p9_p5 = scmp.ge.s32.totalorder %s12_s11, 4   ;;  %s536_s10 = smov %s538_s12 }
  0xe1   :  { %11 = sbr.rel (!%p9_p5) target bundleno = 2 (0x2), region = 58 }

</bundles_post_ra>
